<compile_context>
chip_gen: v7x
topology: tpu7x:2x2x1
jax: 0.10.0
libtpu: 0.0.40
codegen_flags: <defaults>
</compile_context>

<pallas_src>
from functools import partial

import jax
import jax.numpy as jnp
from jax.experimental import pallas as pl
from jax.experimental.pallas import tpu as pltpu


def convblock_kernel(x_ref, hl_ref, hr_ref, keep_ref, w1_ref, b1_ref, w2_ref, b2_ref,
                     o_ref, xs_ref, hs_ref):
    # One (batch, time-tile) grid step, NCW layout (channels = sublanes, time = lanes).
    #   x_ref:    (1, C, Tt)         f32   unpadded input tile
    #   hl_ref:   (1, 1, C, 2*pad)   f32   left-neighbour columns (zeros at seq start)
    #   hr_ref:   (1, 1, C, 2*pad)   f32   right-neighbour columns (zeros at seq end)
    #   keep_ref: (1, 1, 1, Tt+2*pad)f32   (~mask) on the extended window, 0 outside seq
    #   w1_ref:   (width, K*C)       bf16  conv1 weights, tap-major stacked
    #   b1_ref:   (width, 1)         f32
    #   w2_ref:   (cout, K*width)    bf16  conv2 weights, tap-major stacked
    #   b2_ref:   (cout, 1)          f32
    #   o_ref:    (1, cout, Tt)      f32
    #   xs_ref:   (K*C, Tt+2*pad)    bf16  im2col stack for conv1
    #   hs_ref:   (K*width, Tt)      bf16  im2col stack for conv2
    KC, Tte = xs_ref.shape
    C = x_ref.shape[1]
    Tt = o_ref.shape[2]
    K = KC // C
    pad = K // 2
    width = b1_ref.shape[0]

    x_f32 = x_ref[0]                               # (C, Tt) f32, reused for the residual
    x_bf = x_f32.astype(jnp.bfloat16)              # bf16 operand for the MXU
    hl = hl_ref[0, 0].astype(jnp.bfloat16)         # (C, 2*pad)
    hr = hr_ref[0, 0].astype(jnp.bfloat16)         # (C, 2*pad)
    keep_e = keep_ref[0, 0]                        # (1, Tt + 2*pad) f32

    # Halo-extended window in natural time order: column c <-> time t0 - 2*pad + c.
    xe = jnp.concatenate([hl, x_bf, hr], axis=1)   # (C, Tt + 4*pad)

    # ---- conv1 as a single stacked matmul over the extended window [-pad, Tt+pad) ----
    # Slab k, column j  <->  x at time  t0 + j + k - 2*pad.
    for k in range(K):                             # K static -> fully unrolled
        xs_ref[k * C:(k + 1) * C, :] = xe[:, k:k + Tte]
    h = jnp.dot(w1_ref[...], xs_ref[...], preferred_element_type=jnp.float32)
    h = jnp.maximum((h + b1_ref[...]) * keep_e, 0.0)   # MaskedConv1D mask + ReLU (f32)
    h_bf = h.astype(jnp.bfloat16)                  # (width, Tt + 2*pad)

    # ---- conv2: h's out-of-sequence halo columns are already zero (keep_e == 0) ----
    for k in range(K):
        hs_ref[k * width:(k + 1) * width, :] = h_bf[:, k:k + Tt]
    y = jnp.dot(w2_ref[...], hs_ref[...], preferred_element_type=jnp.float32)
    y = (y + b2_ref[...]) * keep_e[:, pad:pad + Tt]    # MaskedConv1D mask
    y = y + x_f32                                  # residual with raw input, offset-0
    o_ref[0] = jnp.maximum(y, 0.0).astype(o_ref.dtype)


def _pick_t_tile(T, max_tile=1024):
    """Largest multiple of 128 that divides T and is <= max_tile (else the full T)."""
    if T <= max_tile:
        return T
    tt = (max_tile // 128) * 128
    while tt >= 128:
        if T % tt == 0:
            return tt
        tt -= 128
    return T


def _pick_vmem_limit():
    """Generation-aware VMEM cap: ~75% of physical, leaving headroom for spills."""
    try:
        cap = pltpu.get_tpu_info().vmem_capacity_bytes
        return int(min(cap * 3 // 4, 112 * 1024 * 1024))
    except Exception:
        return 48 * 1024 * 1024   # safe on every generation (v7x has 64 MiB / TC)


@partial(jax.jit, static_argnames=("t_tile",))
def conv_block_forward(x_nct, mask_bt, w1_oiw, b1, w2_oiw, b2, *, t_tile=None):
    """x_nct: (B, C, T); mask_bt: (B, T) bool (True = masked/invalid position).
    Weights in torch Conv1d layout: w1 (width, C, K), w2 (n_out, width, K)."""
    B, C, T = x_nct.shape
    width, c_in, K = w1_oiw.shape
    cout, w_in, K2 = w2_oiw.shape
    assert c_in == C and w_in == width and K2 == K
    assert K % 2 == 1 and K > 1
    # stride == 1 only (no downsample branch); mask passes through unchanged.
    assert cout == C, "stride==1 ConvBlock residual requires n_out == n_channels"
    pad = K // 2
    p2 = 2 * pad

    x_nct = x_nct.astype(jnp.float32)

    # ---- time tiling ----
    Tt = int(_pick_t_tile(T)) if t_tile is None else int(t_tile)
    assert T % Tt == 0, "time tile must divide T"
    if Tt != T:
        assert Tt % 128 == 0, "time tile must be a multiple of 128 (TPU lane tiling)"
    nT = T // Tt
    Tte = Tt + p2

    # ---- tiny per-tile halo slabs (only 2*pad columns per tile boundary) ----
    zcol = jnp.zeros((B, C, p2), jnp.float32)
    if nT > 1:
        starts = jnp.arange(1, nT) * Tt                              # (nT-1,)
        cols_l = starts[:, None] + jnp.arange(-p2, 0)[None, :]       # columns left of tile j
        cols_r = starts[:, None] + jnp.arange(0, p2)[None, :]        # columns right of tile j-1
        gl = jnp.moveaxis(x_nct[:, :, cols_l], 2, 1)                 # (B, nT-1, C, 2*pad)
        gr = jnp.moveaxis(x_nct[:, :, cols_r], 2, 1)
        halo_l = jnp.concatenate([zcol[:, None], gl], axis=1)        # (B, nT, C, 2*pad)
        halo_r = jnp.concatenate([gr, zcol[:, None]], axis=1)
    else:
        halo_l = zcol[:, None]
        halo_r = zcol[:, None]

    # ---- per-tile keep (=~mask) over the extended window, zero beyond the sequence ----
    keep = (~mask_bt).astype(jnp.float32)                            # (B, T)
    keep_pad = jnp.pad(keep, ((0, 0), (pad, pad)))                   # tiny
    tcols = (jnp.arange(nT) * Tt)[:, None] + jnp.arange(Tte)[None, :]
    keep_t = keep_pad[:, tcols][:, :, None, :]                       # (B, nT, 1, Tte)

    # ---- tap-major stacked bf16 weights, (out, 1) f32 bias columns ----
    w1s = jnp.transpose(w1_oiw, (0, 2, 1)).reshape(width, K * C).astype(jnp.bfloat16)
    w2s = jnp.transpose(w2_oiw, (0, 2, 1)).reshape(cout, K * width).astype(jnp.bfloat16)
    b1c = b1.reshape(width, 1).astype(jnp.float32)
    b2c = b2.reshape(cout, 1).astype(jnp.float32)

    out = pl.pallas_call(
        convblock_kernel,
        out_shape=jax.ShapeDtypeStruct((B, cout, T), jnp.float32),
        grid_spec=pltpu.PrefetchScalarGridSpec(
            num_scalar_prefetch=0,
            grid=(B, nT),
            in_specs=[
                pl.BlockSpec((1, C, Tt), lambda b, j: (b, 0, j)),
                pl.BlockSpec((1, 1, C, p2), lambda b, j: (b, j, 0, 0)),
                pl.BlockSpec((1, 1, C, p2), lambda b, j: (b, j, 0, 0)),
                pl.BlockSpec((1, 1, 1, Tte), lambda b, j: (b, j, 0, 0)),
                pl.BlockSpec((width, K * C), lambda b, j: (0, 0)),
                pl.BlockSpec((width, 1), lambda b, j: (0, 0)),
                pl.BlockSpec((cout, K * width), lambda b, j: (0, 0)),
                pl.BlockSpec((cout, 1), lambda b, j: (0, 0)),
            ],
            out_specs=pl.BlockSpec((1, cout, Tt), lambda b, j: (b, 0, j)),
            scratch_shapes=[
                pltpu.VMEM((K * C, Tte), jnp.bfloat16),     # conv1 im2col stack
                pltpu.VMEM((K * width, Tt), jnp.bfloat16),  # conv2 im2col stack
            ],
        ),
        compiler_params=pltpu.CompilerParams(
            dimension_semantics=("parallel", "parallel"),   # shard (b, tile) over TCs
            vmem_limit_bytes=_pick_vmem_limit(),
        ),
    )(x_nct, halo_l, halo_r, keep_t, w1s, b1c, w2s, b2c)

    # stride == 1  =>  output mask == input mask
    return out, mask_bt


# ---------------- pure-JAX reference (torch Conv1d semantics, NCW, f32) ----------------
def _ref_conv1d(x, w_oiw, b, pad):
    y = jax.lax.conv_general_dilated(
        x, w_oiw, window_strides=(1,), padding=((pad, pad),),
        dimension_numbers=("NCH", "OIH", "NCH"))
    return y + b[None, :, None]


def _ref_convblock(x, mask, W1, B1, W2, B2, pad):
    keep = (~mask).astype(x.dtype)[:, None, :]
    out = _ref_conv1d(x, W1, B1, pad) * keep
    out = jnp.maximum(out, 0.0)
    out = _ref_conv1d(out, W2, B2, pad) * keep
    out = out + x
    out = jnp.maximum(out, 0.0)
    return out, mask


if __name__ == "__main__":
    key = jax.random.PRNGKey(0)

    def run_case(B, C, T, K, expansion, valid_len, t_tile, case_key):
        width = C * expansion
        n_out = C
        pad = K // 2
        kx, kw1, kb1, kw2, kb2 = jax.random.split(case_key, 5)
        x = jax.random.normal(kx, (B, C, T), dtype=jnp.float32)
        mask = jnp.arange(T)[None, :] >= jnp.asarray(valid_len)[:, None]   # (B, T) bool
        W1 = 0.1 * jax.random.normal(kw1, (width, C, K), dtype=jnp.float32)
        B1 = 0.1 * jax.random.normal(kb1, (width,), dtype=jnp.float32)
        W2 = 0.1 * jax.random.normal(kw2, (n_out, width, K), dtype=jnp.float32)
        B2 = 0.1 * jax.random.normal(kb2, (n_out,), dtype=jnp.float32)

        out, out_mask = conv_block_forward(x, mask, W1, B1, W2, B2, t_tile=t_tile)
        out = jax.block_until_ready(out)

        ref_out, ref_mask = _ref_convblock(x, mask, W1, B1, W2, B2, pad)
        assert out.shape == (B, n_out, T)
        assert out_mask.shape == (B, T) and out_mask.dtype == jnp.bool_
        assert bool(jnp.all(out_mask == ref_mask))
        max_err = float(jnp.max(jnp.abs(out - ref_out)))
        # bf16 MXU operands (f32 accumulation) vs an all-f32 reference.
        assert jnp.allclose(out, ref_out, atol=3e-2, rtol=3e-2), max_err
        return max_err

    k1, k2 = jax.random.split(key)
    # Case 1: single time tile (full-T path), module-consistent small shapes.
    run_case(B=2, C=16, T=16, K=3, expansion=2, valid_len=[16, 12], t_tile=None,
             case_key=k1)
    # Case 2: several time tiles -> exercises the cross-tile halo / keep plumbing.
    run_case(B=2, C=16, T=256, K=3, expansion=2, valid_len=[256, 200], t_tile=128,
             case_key=k2)

    print("KERNEL_OK")
</pallas_src>

<mosaic_0001>
module attributes {stable_mosaic.version = 11 : i64} {
  func.func @convblock_kernel(%arg0: i32, %arg1: i32, %arg2: memref<1x16x16xf32, #tpu.memory_space<vmem>>, %arg3: memref<1x1x16x2xf32, #tpu.memory_space<vmem>>, %arg4: memref<1x1x16x2xf32, #tpu.memory_space<vmem>>, %arg5: memref<1x1x1x18xf32, #tpu.memory_space<vmem>>, %arg6: memref<32x48xbf16, #tpu.memory_space<vmem>>, %arg7: memref<32x1xf32, #tpu.memory_space<vmem>>, %arg8: memref<16x96xbf16, #tpu.memory_space<vmem>>, %arg9: memref<16x1xf32, #tpu.memory_space<vmem>>, %arg10: memref<1x16x16xf32, #tpu.memory_space<vmem>>, %arg11: memref<48x18xbf16, #tpu.memory_space<vmem>>, %arg12: memref<96x16xbf16, #tpu.memory_space<vmem>>) attributes {dimension_semantics = [#tpu.dimension_semantics<parallel>, #tpu.dimension_semantics<parallel>], iteration_bounds = array<i64: 2, 1>, scalar_prefetch = 0 : i64, scratch_operands = 2 : i64, tpu.core_type = #tpu.core_type<tc>, window_params = [{transform_indices = @transform_0, window_bounds = array<i64: 1, 16, 16>}, {transform_indices = @transform_1, window_bounds = array<i64: 1, 1, 16, 2>}, {transform_indices = @transform_2, window_bounds = array<i64: 1, 1, 16, 2>}, {transform_indices = @transform_3, window_bounds = array<i64: 1, 1, 1, 18>}, {pipeline_mode = #tpu.pipeline_mode<synchronous>, transform_indices = @transform_4, window_bounds = array<i64: 32, 48>}, {pipeline_mode = #tpu.pipeline_mode<synchronous>, transform_indices = @transform_5, window_bounds = array<i64: 32, 1>}, {pipeline_mode = #tpu.pipeline_mode<synchronous>, transform_indices = @transform_6, window_bounds = array<i64: 16, 96>}, {pipeline_mode = #tpu.pipeline_mode<synchronous>, transform_indices = @transform_7, window_bounds = array<i64: 16, 1>}, {transform_indices = @transform_8, window_bounds = array<i64: 1, 16, 16>}]} {
    %c0 = arith.constant 0 : index
    %c0_0 = arith.constant 0 : index
    %c0_1 = arith.constant 0 : index
    %0 = vector.load %arg2[%c0, %c0_0, %c0_1] : memref<1x16x16xf32, #tpu.memory_space<vmem>>, vector<1x16x16xf32>
    %1 = vector.shape_cast %0 : vector<1x16x16xf32> to vector<16x16xf32>
    %2 = arith.truncf %1 : vector<16x16xf32> to vector<16x16xbf16>
    %c0_2 = arith.constant 0 : index
    %c0_3 = arith.constant 0 : index
    %c0_4 = arith.constant 0 : index
    %c0_5 = arith.constant 0 : index
    %3 = vector.load %arg3[%c0_2, %c0_3, %c0_4, %c0_5] : memref<1x1x16x2xf32, #tpu.memory_space<vmem>>, vector<1x1x16x2xf32>
    %4 = vector.shape_cast %3 : vector<1x1x16x2xf32> to vector<16x2xf32>
    %5 = arith.truncf %4 : vector<16x2xf32> to vector<16x2xbf16>
    %c0_6 = arith.constant 0 : index
    %c0_7 = arith.constant 0 : index
    %c0_8 = arith.constant 0 : index
    %c0_9 = arith.constant 0 : index
    %6 = vector.load %arg4[%c0_6, %c0_7, %c0_8, %c0_9] : memref<1x1x16x2xf32, #tpu.memory_space<vmem>>, vector<1x1x16x2xf32>
    %7 = vector.shape_cast %6 : vector<1x1x16x2xf32> to vector<16x2xf32>
    %8 = arith.truncf %7 : vector<16x2xf32> to vector<16x2xbf16>
    %c0_10 = arith.constant 0 : index
    %c0_11 = arith.constant 0 : index
    %c0_12 = arith.constant 0 : index
    %c0_13 = arith.constant 0 : index
    %9 = vector.load %arg5[%c0_10, %c0_11, %c0_12, %c0_13] : memref<1x1x1x18xf32, #tpu.memory_space<vmem>>, vector<1x1x1x18xf32>
    %10 = vector.shape_cast %9 : vector<1x1x1x18xf32> to vector<1x18xf32>
    %11 = tpu.concatenate %5, %2, %8 in 1 : vector<16x2xbf16>, vector<16x16xbf16>, vector<16x2xbf16> -> vector<16x20xbf16>
    %12 = vector.extract_strided_slice %11 {offsets = [0, 0], sizes = [16, 18], strides = [1, 1]} : vector<16x20xbf16> to vector<16x18xbf16>
    %c0_14 = arith.constant 0 : index
    %c0_15 = arith.constant 0 : index
    %13 = vector.load %arg11[%c0_14, %c0_15] : memref<48x18xbf16, #tpu.memory_space<vmem>>, vector<16x18xbf16>
    tpu.vector_store %arg11[%c0_14, %c0_15], %12 {strides = array<i32>} : memref<48x18xbf16, #tpu.memory_space<vmem>>, vector<16x18xbf16>,
    %14 = vector.extract_strided_slice %11 {offsets = [0, 1], sizes = [16, 18], strides = [1, 1]} : vector<16x20xbf16> to vector<16x18xbf16>
    %c16 = arith.constant 16 : index
    %c0_16 = arith.constant 0 : index
    %15 = vector.load %arg11[%c16, %c0_16] : memref<48x18xbf16, #tpu.memory_space<vmem>>, vector<16x18xbf16>
    tpu.vector_store %arg11[%c16, %c0_16], %14 {strides = array<i32>} : memref<48x18xbf16, #tpu.memory_space<vmem>>, vector<16x18xbf16>,
    %16 = vector.extract_strided_slice %11 {offsets = [0, 2], sizes = [16, 18], strides = [1, 1]} : vector<16x20xbf16> to vector<16x18xbf16>
    %c32 = arith.constant 32 : index
    %c0_17 = arith.constant 0 : index
    %17 = vector.load %arg11[%c32, %c0_17] : memref<48x18xbf16, #tpu.memory_space<vmem>>, vector<16x18xbf16>
    tpu.vector_store %arg11[%c32, %c0_17], %16 {strides = array<i32>} : memref<48x18xbf16, #tpu.memory_space<vmem>>, vector<16x18xbf16>,
    %c0_18 = arith.constant 0 : index
    %c0_19 = arith.constant 0 : index
    %18 = vector.load %arg6[%c0_18, %c0_19] : memref<32x48xbf16, #tpu.memory_space<vmem>>, vector<32x48xbf16>
    %c0_20 = arith.constant 0 : index
    %c0_21 = arith.constant 0 : index
    %19 = vector.load %arg11[%c0_20, %c0_21] : memref<48x18xbf16, #tpu.memory_space<vmem>>, vector<48x18xbf16>
    %cst = arith.constant dense<0.000000e+00> : vector<32x18xf32>
    %20 = tpu.matmul %18, %19, %cst {dimension_numbers = #tpu.dot_dimension_numbers<[1], [0], [0], [1], [0, 0, 1, 1], [], []>} : vector<32x48xbf16>, vector<48x18xbf16>, vector<32x18xf32> -> vector<32x18xf32>
    %c0_22 = arith.constant 0 : index
    %c0_23 = arith.constant 0 : index
    %21 = vector.load %arg7[%c0_22, %c0_23] : memref<32x1xf32, #tpu.memory_space<vmem>>, vector<32x1xf32>
    %22 = vector.broadcast %21 : vector<32x1xf32> to vector<32x18xf32>
    %23 = arith.addf %20, %22 : vector<32x18xf32>
    %24 = vector.broadcast %10 : vector<1x18xf32> to vector<32x18xf32>
    %25 = arith.mulf %23, %24 : vector<32x18xf32>
    %cst_24 = arith.constant 0.000000e+00 : f32
    %26 = vector.broadcast %cst_24 : f32 to vector<32x18xf32>
    %27 = arith.maximumf %25, %26 : vector<32x18xf32>
    %28 = arith.truncf %27 : vector<32x18xf32> to vector<32x18xbf16>
    %29 = vector.extract_strided_slice %28 {offsets = [0, 0], sizes = [32, 16], strides = [1, 1]} : vector<32x18xbf16> to vector<32x16xbf16>
    %c0_25 = arith.constant 0 : index
    %c0_26 = arith.constant 0 : index
    %30 = vector.load %arg12[%c0_25, %c0_26] : memref<96x16xbf16, #tpu.memory_space<vmem>>, vector<32x16xbf16>
    tpu.vector_store %arg12[%c0_25, %c0_26], %29 {strides = array<i32>} : memref<96x16xbf16, #tpu.memory_space<vmem>>, vector<32x16xbf16>,
    %31 = vector.extract_strided_slice %28 {offsets = [0, 1], sizes = [32, 16], strides = [1, 1]} : vector<32x18xbf16> to vector<32x16xbf16>
    %c32_27 = arith.constant 32 : index
    %c0_28 = arith.constant 0 : index
    %32 = vector.load %arg12[%c32_27, %c0_28] : memref<96x16xbf16, #tpu.memory_space<vmem>>, vector<32x16xbf16>
    tpu.vector_store %arg12[%c32_27, %c0_28], %31 {strides = array<i32>} : memref<96x16xbf16, #tpu.memory_space<vmem>>, vector<32x16xbf16>,
    %33 = vector.extract_strided_slice %28 {offsets = [0, 2], sizes = [32, 16], strides = [1, 1]} : vector<32x18xbf16> to vector<32x16xbf16>
    %c64 = arith.constant 64 : index
    %c0_29 = arith.constant 0 : index
    %34 = vector.load %arg12[%c64, %c0_29] : memref<96x16xbf16, #tpu.memory_space<vmem>>, vector<32x16xbf16>
    tpu.vector_store %arg12[%c64, %c0_29], %33 {strides = array<i32>} : memref<96x16xbf16, #tpu.memory_space<vmem>>, vector<32x16xbf16>,
    %c0_30 = arith.constant 0 : index
    %c0_31 = arith.constant 0 : index
    %35 = vector.load %arg8[%c0_30, %c0_31] : memref<16x96xbf16, #tpu.memory_space<vmem>>, vector<16x96xbf16>
    %c0_32 = arith.constant 0 : index
    %c0_33 = arith.constant 0 : index
    %36 = vector.load %arg12[%c0_32, %c0_33] : memref<96x16xbf16, #tpu.memory_space<vmem>>, vector<96x16xbf16>
    %cst_34 = arith.constant dense<0.000000e+00> : vector<16x16xf32>
    %37 = tpu.matmul %35, %36, %cst_34 {dimension_numbers = #tpu.dot_dimension_numbers<[1], [0], [0], [1], [0, 0, 1, 1], [], []>} : vector<16x96xbf16>, vector<96x16xbf16>, vector<16x16xf32> -> vector<16x16xf32>
    %c0_35 = arith.constant 0 : index
    %c0_36 = arith.constant 0 : index
    %38 = vector.load %arg9[%c0_35, %c0_36] : memref<16x1xf32, #tpu.memory_space<vmem>>, vector<16x1xf32>
    %39 = vector.broadcast %38 : vector<16x1xf32> to vector<16x16xf32>
    %40 = arith.addf %37, %39 : vector<16x16xf32>
    %41 = vector.extract_strided_slice %10 {offsets = [0, 1], sizes = [1, 16], strides = [1, 1]} : vector<1x18xf32> to vector<1x16xf32>
    %42 = vector.broadcast %41 : vector<1x16xf32> to vector<16x16xf32>
    %43 = arith.mulf %40, %42 : vector<16x16xf32>
    %44 = arith.addf %43, %1 : vector<16x16xf32>
    %cst_37 = arith.constant 0.000000e+00 : f32
    %45 = vector.broadcast %cst_37 : f32 to vector<16x16xf32>
    %46 = arith.maximumf %44, %45 : vector<16x16xf32>
    %c0_38 = arith.constant 0 : index
    %c0_39 = arith.constant 0 : index
    %c0_40 = arith.constant 0 : index
    %47 = vector.load %arg10[%c0_38, %c0_39, %c0_40] : memref<1x16x16xf32, #tpu.memory_space<vmem>>, vector<1x16x16xf32>
    %48 = vector.shape_cast %47 : vector<1x16x16xf32> to vector<16x16xf32>
    %49 = vector.shape_cast %46 : vector<16x16xf32> to vector<1x16x16xf32>
    tpu.vector_store %arg10[%c0_38, %c0_39, %c0_40], %49 {strides = array<i32>} : memref<1x16x16xf32, #tpu.memory_space<vmem>>, vector<1x16x16xf32>,
    return
  }
  func.func @transform_0(%arg0: i32, %arg1: i32) -> (i32, i32, i32) {
    %c0_i32 = arith.constant 0 : i32
    %c0_i32_0 = arith.constant 0 : i32
    return %arg0, %c0_i32, %arg1 : i32, i32, i32
  }
  func.func @transform_1(%arg0: i32, %arg1: i32) -> (i32, i32, i32, i32) {
    %c0_i32 = arith.constant 0 : i32
    %c0_i32_0 = arith.constant 0 : i32
    %c0_i32_1 = arith.constant 0 : i32
    return %arg0, %arg1, %c0_i32, %c0_i32_0 : i32, i32, i32, i32
  }
  func.func @transform_2(%arg0: i32, %arg1: i32) -> (i32, i32, i32, i32) {
    %c0_i32 = arith.constant 0 : i32
    %c0_i32_0 = arith.constant 0 : i32
    %c0_i32_1 = arith.constant 0 : i32
    return %arg0, %arg1, %c0_i32, %c0_i32_0 : i32, i32, i32, i32
  }
  func.func @transform_3(%arg0: i32, %arg1: i32) -> (i32, i32, i32, i32) {
    %c0_i32 = arith.constant 0 : i32
    %c0_i32_0 = arith.constant 0 : i32
    %c0_i32_1 = arith.constant 0 : i32
    return %arg0, %arg1, %c0_i32, %c0_i32_0 : i32, i32, i32, i32
  }
  func.func @transform_4(%arg0: i32, %arg1: i32) -> (i32, i32) {
    %c0_i32 = arith.constant 0 : i32
    %c0_i32_0 = arith.constant 0 : i32
    %c0_i32_1 = arith.constant 0 : i32
    return %c0_i32, %c0_i32_0 : i32, i32
  }
  func.func @transform_5(%arg0: i32, %arg1: i32) -> (i32, i32) {
    %c0_i32 = arith.constant 0 : i32
    %c0_i32_0 = arith.constant 0 : i32
    %c0_i32_1 = arith.constant 0 : i32
    return %c0_i32, %c0_i32_0 : i32, i32
  }
  func.func @transform_6(%arg0: i32, %arg1: i32) -> (i32, i32) {
    %c0_i32 = arith.constant 0 : i32
    %c0_i32_0 = arith.constant 0 : i32
    %c0_i32_1 = arith.constant 0 : i32
    return %c0_i32, %c0_i32_0 : i32, i32
  }
  func.func @transform_7(%arg0: i32, %arg1: i32) -> (i32, i32) {
    %c0_i32 = arith.constant 0 : i32
    %c0_i32_0 = arith.constant 0 : i32
    %c0_i32_1 = arith.constant 0 : i32
    return %c0_i32, %c0_i32_0 : i32, i32
  }
  func.func @transform_8(%arg0: i32, %arg1: i32) -> (i32, i32, i32) {
    %c0_i32 = arith.constant 0 : i32
    %c0_i32_0 = arith.constant 0 : i32
    return %arg0, %c0_i32, %arg1 : i32, i32, i32
  }
}

</mosaic_0001>

<bundles_post_ra>
// kernel: conv_block_forward.1
= control target key start
LH: loop header
LB: loop body
LE: loop exit
PB: predicated region body
PF: predicated region fallthrough
CT: control target
= control target key end

     0   :  { %13 = vsyncpa [#allocation5], 0  ;;  %s1273_s0 = inlined_call_operand.vmem [shape: f32[2,16,16], index: 0, kind: input, shape index: {}]   ;;  %s1274_s1 = inlined_call_operand.vmem [shape: f32[2,1,16,2], index: 1, kind: input, shape index: {}, may-alias: {1,2}]   ;;  %s1275_s2 = inlined_call_operand.vmem [shape: f32[2,1,16,2], index: 2, kind: input, shape index: {}, may-alias: {1,2}]   ;;  %s1276_s3 = inlined_call_operand.vmem [shape: f32[2,1,1,18], index: 3, kind: input, shape index: {}]   ;;  %s1277_s4 = inlined_call_operand.vmem [shape: bf16[32,48], index: 4, kind: input, shape index: {}]   ;;  %s1278_s5 = inlined_call_operand.vmem [shape: f32[32,1], index: 5, kind: input, shape index: {}]   ;;  %s1279_s6 = inlined_call_operand.vmem [shape: bf16[16,96], index: 6, kind: input, shape index: {}]   ;;  %s1280_s7 = inlined_call_operand.vmem [shape: f32[16,1], index: 7, kind: input, shape index: {}]   ;;  %s1281_s8 = inlined_call_operand.hbm [shape: f32[2,16,16], index: 8, kind: output, shape index: {}]  }
   0x1   :  { %15 = vsyncpa [#allocation5 + $0x1], 0  ;;  %s1089_s27 = smov 0   ;;  %s1091_s28 = smov 0  }
   0x2   :  { %s1093_s29 = smov 0   ;;  %s1095_s30 = smov 0  }
   0x3   :  { %s1097_s9 = smov 0   ;;  %s1099_s10 = smov 0  }
   0x4 LB: > { %s819_s11 = sadd.s32 4294967295, %s1032_s10   ;;  %s820_s12 = sadd.s32 4294967294, %s1032_s10   ;;  %s1032_s10 = sphi %s1099_s10, %s21_s10   ;;  %s1028_s9 = sphi %s1097_s9, %s1288_s9   ;;  %s1024_s30 = sphi %s1095_s30, %s1287_s30   ;;  %s1020_s29 = sphi %s1093_s29, %s1286_s29   ;;  %s1016_s28 = sphi %s1091_s28, %s1285_s28   ;;  %s1012_s27 = sphi %s1089_s27, %s1284_s27  }
   0x5   : > { %s33_s13 = sadd.s32 1, %s1028_s9  ;;  %s238_s14 = sadd.s32 1, %s1020_s29 }
   0x6   : > { %p35_p0 = scmp.ge.s32.totalorder %s33_s13, 2  ;;  %p248_p1 = scmp.ne.s32.totalorder %s1020_s29, %s1016_s28 }
   0x7   : > { %p249_p2 = scmp.eq.s32.totalorder %s819_s11, 1  ;;  %p254_p3 = scmp.ne.s32.totalorder %s1016_s28, %s1012_s27 }
   0x8   : > { %s1290_s13 = smov (%p35_p0, %s33_s13), 0  ;;  %p255_p5 = scmp.eq.s32.totalorder %s820_s12, 1 }
   0x9   : > { %p1129_p4 = por %p249_p2, %p248_p1  ;;  %s233_s16 = ssub.s32 %s1028_s9, %s1290_s13 }
   0xa   : > { %p823_p6 = scmp.ge.s32.totalorder %s1032_s10, 1  ;;  %p236_p7 = scmp.eq.s32.totalorder %s233_s16, 0 }
   0xb   : > { %p1136_p8 = por %p255_p5, %p254_p3  ;;  %p329_p9 = scmp.lt.s32.totalorder %s1032_s10, 3 }
   0xc   : > { %s1142_s18 = scalar_select %p236_p7, %s1020_s29, %s238_s14  }
   0xd   : > { %p330_p10 = pnand %p823_p6, %p329_p9 }
   0xe   : > { %p390_p11 = scmp.lt.s32.totalorder (!%p330_p10), %s1024_s30, 1  ;;  %s1034_s11 = smov (!%p330_p10), 2   ;;  %vm439_vm0 = vcmask (!%p330_p10), 15360   ;;  %vm443_vm1 = vcmask (!%p330_p10), 146432   ;;  %v951_v13 = vld [vmem:[%s1277_s4] sm:$0xff] (!%p330_p10)   ;;  %vm498_vm2 = vcmask (!%p330_p10), 392192  }
   0xf   : > { %333 = sbr.rel (%p330_p10) target bundleno = 878 (0x36e), region = 52  ;;  %s1035_s12 = smov (!%p330_p10), 18   ;;  %865 = vmatprep.mubr.msk.bf16.mxu0 (!%p330_p10), %vm498_vm2, %v951_v13  ;;  %v464_v14 = vld [vmem:[%s1278_s5] sm:$0xff] (!%p330_p10)  ;;  %v1038_v15 = vmov (!%p330_p10), 0   ;;  %v465_v16 = vld [vmem:[%s1278_s5 + $0x8] sm:$0xff] (!%p330_p10)  ;;  %v467_v17 = vld [vmem:[%s1278_s5 + $0x18] sm:$0xff] (!%p330_p10) }
  0x10   : > { %s1036_s22 = smov (!%p330_p10), 127   ;;  %949 = vset.pattern.permute.xlu0 (!%p330_p10), %v1038_v15  ;;  %950 = vset.pattern.permute.xlu1 (!%p330_p10), %v1038_v15  ;;  %v466_v19 = vld [vmem:[%s1278_s5 + $0x10] sm:$0xff] (!%p330_p10)  ;;  %v952_v24 = vld [vmem:[%s1277_s4 + $0x8] sm:$0xff] (!%p330_p10)   ;;  %v1039_v25 = vmov (!%p330_p10), 0.0   ;;  %vm570_vm3 = vcmask (!%p330_p10), 130048   ;;  %v599_v50 = vld [vmem:[%s1280_s7] sm:$0xff] (!%p330_p10) }
  0x11   : > { %869 = vmatprep.subr.bf16.mxu1 (!%p330_p10), %v1039_v25  ;;  %v600_v49 = vld [vmem:[%s1280_s7 + $0x8] sm:$0xff] (!%p330_p10)  ;;  %vm1040_vm4 = vmmov (!%p330_p10), 0   ;;  %v953_v61 = vld [vmem:[%s1279_s6] sm:$0xff] (!%p330_p10)   ;;  %vm616_vm5 = vcmask (!%p330_p10), 785408  }
  0x12   : > { %881 = vmatprep.mubr.msk.bf16.mxu1 (!%p330_p10), %vm1040_vm4, %v1039_v25 }
  0x16   : > { %s1146_s19 = scalar_select %p390_p11, %s1024_s30, 1 }
  0x18   : > { %s843_s20 = sshll.u32 %s1146_s19, 4 }
  0x19   : > { %s397_s23 = scalar_lea.vmem %s1273_s0, %s843_s20  ;;  %s415_s26 = scalar_lea.vmem %s1275_s2, %s843_s20 }
  0x1a   : > { %v1152_v0 = vld [vmem:[%s397_s23] sm:$0xff]  ;;  %v1154_v1 = vld [vmem:[%s397_s23 + $0x8] sm:$0xff]  ;;  %s406_s21 = scalar_lea.vmem %s1274_s1, %s843_s20  ;;  %s387_s23 = sand.u32 1, %s1016_s28  }
  0x1b   : > { %v425_v2 = vpack.c.bf16 %v1154_v1, %v1152_v0  ;;  %v429_v3 = vld [vmem:[%s415_s26] sm:$0xff]  ;;  %v430_v4 = vld [vmem:[%s415_s26 + $0x8] sm:$0xff]  ;;  %s1037_s26 = smov 126   ;;  %s824_s24 = sshll.u32 %s387_s23, 4 }
  0x1c   : > { %v431_v5 = vpack.c.bf16 %v430_v4, %v429_v3  ;;  %v426_v6 = vld [vmem:[%s406_s21] sm:$0xff]  ;;  %v427_v7 = vld [vmem:[%s406_s21 + $0x8] sm:$0xff]  ;;  %s846_s20 = sshll.u32 %s1024_s30, 8  ;;  %s389_s25 = scalar_lea.vmem [#allocation4], %s824_s24 }
  0x1d   : > { %434 = vrot.lane.b32.xlu0 %v425_v2, %s1034_s11  ;;  %v428_v8 = vpack.c.bf16 %v427_v7, %v426_v6  ;;  %s687_s11 = sshll.u32 %s389_s25, 4  ;;  %s1221_s14 = scalar_lea.hbm %s1281_s8, %s846_s20  ;;  %s1223_s11 = int_to_ptr.vmem [resolvable:$true] %s687_s11 }
  0x1e   : > { %s1227_s30 = scalar_lea.sflag [#allocation5], %s387_s23  ;;  %s954_s16 = scalar_lea.vmem %s1223_s11, 256 }
  0x1f   : > { %p955_p12 = scmp.ne.s32.totalorder %s1223_s11, %s954_s16  ;;  %s1041_s21 = smov [#allocation4]  }
  0x21   : > { %437 = vrot.lane.b32.xlu0 %v431_v5, %s1035_s12  ;;  %s421_s12 = scalar_lea.vmem %s1276_s3, %s1146_s19  ;;  %p956_p13 = pnand %p955_p12, %p1129_p4 }
  0x22   : > { %v835_v29 = vld [vmem:[%s421_s12] ss:$0 sm:$0xff] }
  0x23   : > { %p957_p0 = pneg %p956_p13 }
  0x25   : > { %470 = vperm.xlu0 %949, %v464_v14  }
  0x29   : > { %485 = vperm.xlu0 %949, %v467_v17  }
  0x8f   : > { %v435_v9 = vpop.permute.xlu0 %434 }
  0x90   : > { %v442_v10 = vsel %vm439_vm0, %v428_v8, %v435_v9 }
  0x93   : > { %v438_v11 = vpop.permute.xlu0 %437 }
  0x94   : > { %v445_v12 = vsel %vm443_vm1, %v442_v10, %v438_v11 }
  0x95   : > { %449 = vrot.lane.b32.xlu1 %v445_v12, %s1036_s22  ;;  %447 = vst.msk [vmem:[#allocation2] sm:$0xff] %vm443_vm1, %v445_v12 }
  0x99   : > { %453 = vrot.lane.b32.xlu1 %v445_v12, %s1037_s26 }
  0x9c   : > { %v461_v18 = vld [vmem:[#allocation2] sm:$0xff] }
  0x9d   : > { %859 = vmatprep.subr.bf16.mxu0 %v461_v18  ;;  %475 = vperm.xlu1 %950, %v465_v16  }
  0x9e   : > { %860 = vmatpush3.bf16.msra.mxu0 %v461_v18 }
  0xa1   : > { %480 = vperm.xlu1 %950, %v466_v19  }
  0xa4   : > { %v471_v27 = vpop.permute.xlu0 %470 }
  0xa8   : > { %v486_v31 = vpop.permute.xlu0 %485 }
 0x107   : > { %v450_v20 = vpop.permute.xlu1 %449 }
 0x108   : > { %452 = vst.msk [vmem:[#allocation2 + $0x8] sm:$0xff] %vm443_vm1, %v450_v20 }
 0x10b   : > { %v454_v21 = vpop.permute.xlu1 %453 }
 0x10c   : > { %456 = vst.msk [vmem:[#allocation2 + $0x10] sm:$0xff] %vm443_vm1, %v454_v21 }
 0x10f   : > { %v462_v22 = vld [vmem:[#allocation2 + $0x8] sm:$0xff] }
 0x110   : > { %861 = vmatprep.subr.bf16.mxu0 %v462_v22 }
 0x111   : > { %862 = vmatpush3.bf16.msra.mxu0 %v462_v22 }
 0x113   : > { %v463_v23 = vld [vmem:[#allocation2 + $0x10] sm:$0xff] }
 0x114   : > { %863 = vmatprep.subr.bf16.mxu0 %v463_v23 }
 0x115   : > { %864 = vmatpush3.bf16.msra.mxu0 %v463_v23 }
 0x118   : > { %866 = vmatmul.mubr.msk.bf16.vlgmr.msra.gmra.mrb[0].mxu0 %vm498_vm2, %v952_v24 }
 0x11c   : > { %v476_v26 = vpop.permute.xlu1 %475 }
 0x120   : > { %v481_v28 = vpop.permute.xlu1 %480 }
 0x1eb   : > { %v867_v30 = vpop.f32.mrb[0].mxu0 }
 0x1ec   : > { %v548_v32 = vadd.f32 %v867_v30, %v481_v28  ;;  %v539_v33 = vpop.f32.mrb[1].mxu0 }
 0x1ed   : > { %v540_v34 = vadd.f32 %v539_v33, %v471_v27  ;;  %v868_v35 = vpop.f32.mrb[2].mxu0 }
 0x1ee   : > { %v562_v36 = vmul.f32 %v835_v29, %v548_v32  ;;  %v551_v37 = vadd.f32 %v868_v35, %v486_v31  ;;  %v542_v38 = vpop.f32.mrb[3].mxu0 }
 0x1ef   : > { %v560_v39 = vmul.f32 %v835_v29, %v540_v34  ;;  %v543_v40 = vadd.f32 %v542_v38, %v476_v26 }
 0x1f0   : > { %v563_v41 = vmul.f32 %v835_v29, %v551_v37  ;;  %v566_v43 = vmax.f32 %v562_v36, 0.0 }
 0x1f1   : > { %v561_v42 = vmul.f32 %v835_v29, %v543_v40  ;;  %v564_v45 = vmax.f32 %v560_v39, 0.0 }
 0x1f2   : > { %v567_v44 = vmax.f32 %v563_v41, 0.0 }
 0x1f3   : > { %v565_v46 = vmax.f32 %v561_v42, 0.0 }
 0x1f4   : > { %v569_v47 = vpack.c.bf16 %v567_v44, %v566_v43 }
 0x1f5   : > { %v568_v48 = vpack.c.bf16 %v565_v46, %v564_v45 }
 0x1f6   : > { %577 = vrot.lane.b32.xlu0 %v569_v47, %s1036_s22  ;;  %572 = vst.msk [vmem:[#allocation3 + $0x8] sm:$0xff] %vm570_vm3, %v569_v47 }
 0x1f7   : > { %575 = vrot.lane.b32.xlu1 %v568_v48, %s1036_s22  ;;  %571 = vst.msk [vmem:[#allocation3] sm:$0xff] %vm570_vm3, %v568_v48 }
 0x1fa   : > { %585 = vrot.lane.b32.xlu0 %v569_v47, %s1037_s26 }
 0x1fb   : > { %583 = vrot.lane.b32.xlu1 %v568_v48, %s1037_s26 }
 0x1fd   : > { %v594_v52 = vld [vmem:[#allocation3 + $0x8] sm:$0xff] }
 0x1fe   : > { %608 = vperm.xlu0 %949, %v600_v49   ;;  %v593_v51 = vld [vmem:[#allocation3] sm:$0xff] }
 0x1ff   : > { %603 = vperm.xlu1 %950, %v599_v50   ;;  %870 = vmatpush3.bf16.msra.mxu1 %v593_v51 }
 0x200   : > { %871 = vmatprep.subr.bf16.mxu1 %v1039_v25 }
 0x203   : > { %872 = vmatpush3.bf16.msra.mxu1 %v594_v52  ;;  %661 = vrot.lane.b32.xlu1 %v835_v29, %s1036_s22  ;;  %s958_s22 = sshll.u32 %s1041_s21, 4  ;;  %s959_s22 = int_to_ptr.vmem [resolvable:$false] %s958_s22 }
 0x204   : > { %873 = vmatprep.subr.bf16.mxu1 %v1039_v25  ;;  %s960_s26 = scalar_lea.vmem %s959_s22, 512  ;;  %p961_p1 = scmp.lt.s32.totalorder %s1223_s11, %s959_s22 }
 0x205   : > { %p962_p2 = scmp.lt.s32.totalorder %s960_s26, %s954_s16 }
 0x207   : > { %p963_p3 = por %p962_p2, %p961_p1 }
 0x209   : > { %p964_p5 = pnand %p963_p3, %p957_p0 }
 0x268   : > { %v578_v53 = vpop.permute.xlu0 %577 }
 0x269   : > { %582 = vst.msk [vmem:[#allocation3 + $0x18] sm:$0xff] %vm570_vm3, %v578_v53  ;;  %v576_v54 = vpop.permute.xlu1 %575 }
 0x26a   : > { %581 = vst.msk [vmem:[#allocation3 + $0x10] sm:$0xff] %vm570_vm3, %v576_v54 }
 0x26c   : > { %v586_v55 = vpop.permute.xlu0 %585 }
 0x26d   : > { %590 = vst.msk [vmem:[#allocation3 + $0x28] sm:$0xff] %vm570_vm3, %v586_v55  ;;  %v584_v56 = vpop.permute.xlu1 %583 }
 0x26e   : > { %589 = vst.msk [vmem:[#allocation3 + $0x20] sm:$0xff] %vm570_vm3, %v584_v56 }
 0x270   : > { %v596_v58 = vld [vmem:[#allocation3 + $0x18] sm:$0xff] }
 0x271   : > { %v595_v57 = vld [vmem:[#allocation3 + $0x10] sm:$0xff] }
 0x272   : > { %874 = vmatpush3.bf16.msra.mxu1 %v595_v57 }
 0x273   : > { %875 = vmatprep.subr.bf16.mxu1 %v1039_v25 }
 0x274   : > { %v598_v60 = vld [vmem:[#allocation3 + $0x28] sm:$0xff] }
 0x275   : > { %v597_v59 = vld [vmem:[#allocation3 + $0x20] sm:$0xff] }
 0x276   : > { %876 = vmatpush3.bf16.msra.mxu1 %v596_v58 }
 0x277   : > { %877 = vmatprep.subr.bf16.mxu1 %v1039_v25 }
 0x27a   : > { %878 = vmatpush3.bf16.msra.mxu1 %v597_v59 }
 0x27b   : > { %879 = vmatprep.subr.bf16.mxu1 %v1039_v25 }
 0x27d   : > { %v609_v5 = vpop.permute.xlu0 %608 }
 0x27e   : > { %880 = vmatpush3.bf16.msra.mxu1 %v598_v60  ;;  %v604_v62 = vpop.permute.xlu1 %603 }
 0x281   : > { %882 = vmatmul.mubr.msk.bf16.vlgmr.msra.gmra.mrb[0].mxu1 %vm616_vm5, %v953_v61 }
 0x282   : > { %v662_v2 = vpop.permute.xlu1 %661 }
 0x354   : > { %v654_v63 = vpop.f32.mrb[0].mxu1 }
 0x355   : > { %v655_v3 = vadd.f32 %v654_v63, %v604_v62  ;;  %v883_v4 = vpop.f32.mrb[1].mxu1 }
 0x356   : > { %v657_v6 = vpop.f32.mrb[2].mxu1 }
 0x357   : > { %v664_v7 = vmul.f32 %v662_v2, %v655_v3  ;;  %v658_v8 = vadd.f32 %v657_v6, %v609_v5  ;;  %v884_v9 = vpop.f32.mrb[3].mxu1 }
 0x359   : > { %v666_v10 = vadd.f32 %v664_v7, %v1152_v0  ;;  %v665_v11 = vmul.f32 %v662_v2, %v658_v8 }
 0x35b   : > { %v668_v12 = vmax.f32 %v666_v10, 0.0  ;;  %v667_v13 = vadd.f32 %v665_v11, %v1154_v1 }
 0x35d   : > { %670 = vst.msk [vmem:[%s389_s25] sm:$0xff] %vm570_vm3, %v668_v12  ;;  %v669_v0 = vmax.f32 %v667_v13, 0.0 }
 0x35f   : > { %671 = vst.msk [vmem:[%s389_s25 + $0x8] sm:$0xff] %vm570_vm3, %v669_v0 }
 0x360   : > { %967 = shalt.err (!%p964_p5)
}
 0x361   : > { %s968_s23 = scalar_lea.hbm %s1221_s14, 256  ;;  %s972_s25 = scalar_lea.hbm %s1281_s8, 512 }
 0x362   : > { %p969_p6 = scmp.ne.s32.totalorder %s1221_s14, %s968_s23  ;;  %p973_p10 = scmp.lt.u32.totalorder %s1221_s14, %s1281_s8 }
 0x363   : > { %p974_p11 = scmp.lt.u32.totalorder %s972_s25, %s968_s23  ;;  %p976_p13 = scmp.lt.u32.totalorder %s968_s23, %s1221_s14 }
 0x364   : > { %p970_p7 = pnand %p969_p6, %p1129_p4 }
 0x365   : > { %p975_p12 = por %p974_p11, %p973_p10 }
 0x366   : > { %p971_p9 = pneg %p970_p7 }
 0x367   : > { %p977_p0 = por %p976_p13, %p975_p12 }
 0x369   : > { %p978_p1 = pnand %p977_p0, %p971_p9 }
 0x36b   : > { %981 = shalt.err (!%p978_p1)
}
 0x36c   : > { %s1042_s16 = smov 128   ;;  %s1043_s21 = smov 8  }
 0x36d   : > { %885 = dma.vmem_to_hbm [thread:$0]  (%p1129_p4), %s1223_s11, 256, %s1221_s14, %s1227_s30, %s1042_s16, %s1042_s16, %s1043_s21  }
 0x36e PF: > { %p891_p2 = scmp.ge.s32.totalorder %s1032_s10, 2  ;;  %s702_s22 = sand.u32 1, %s1012_s27  }
 0x36f   : > { %s703_s26 = scalar_lea.sflag [#allocation5], %s702_s22 }
 0x370   : > { %p888_p3 = pnand %p891_p2, %p1136_p8 }
 0x372   : > { %1007 = dma.done.wait (!%p888_p3), %s703_s26, 256  }
 0x373   : > { %1009 = vsyncadd (!%p888_p3), %s703_s26, 4294967040  ;;  %s21_s10 = sadd.s32 1, %s1032_s10   ;;  %s1284_s27 = smov %s1016_s28 }
 0x374   : > { %p18_p5 = scmp.ge.s32.totalorder %s21_s10, 4   ;;  %s1285_s28 = smov %s1020_s29 }
 0x375   : > { %s1286_s29 = smov %s1142_s18  ;;  %s1287_s30 = smov %s1028_s9 }
 0x376   : > { %s1288_s9 = smov %s1290_s13  ;;  %20 = sbr.rel (!%p18_p5) target bundleno = 4 (0x4), region = 96 }
 0x37d   :  { %708 = vsyncpa [#allocation5], 1 }
 0x37e   :  { %710 = vsyncpa [#allocation5 + $0x1], 1 }

</bundles_post_ra>
